<compile_context>
chip_gen: v5e
topology: v5e:2x2
jax: 0.10.0
libtpu: 0.0.40
codegen_flags: <defaults>
</compile_context>

<pallas_src>
import jax
import jax.numpy as jnp
from jax.experimental import pallas as pl
from jax.experimental.pallas import tpu as pltpu

# Rational('relu'), version A, degrees (5, 4): numerator a0..a5, denominator b1..b4.
NUM_COEFFS = (0.02996348, 0.61690165, 2.37539147, 3.06608078, 1.52474449, 0.25281987)
DEN_COEFFS = (1.19160814, 4.40811795, 0.91111034, 0.34885983)

LANES = 128
# 8192 x 128 f32 = 4 MiB per block; 2 bufs x (in + out) = 16 MiB live in VMEM.
TARGET_BLOCK_ROWS = 8192
VMEM_LIMIT_BYTES = 32 * 1024 * 1024  # explicit: clears v5e's 16 MiB scoped default


def _rational_kernel(x_ref, o_ref):
    """Elementwise rational activation on one (block_rows, 128) tile."""
    x = x_ref[...].astype(jnp.float32)

    a = NUM_COEFFS
    b = DEN_COEFFS

    # Numerator P(x) via Horner's scheme, seeded directly with the top term.
    p = x * a[5] + a[4]
    for i in range(3, -1, -1):
        p = p * x + a[i]

    # Denominator Q(x) = 1 + |x * (b1 + b2*x + b3*x^2 + b4*x^3)|  (version A).
    q = x * b[3] + b[2]
    for i in range(1, -1, -1):
        q = q * x + b[i]
    q = 1.0 + jnp.abs(q * x)

    # Reciprocal on the EUP slot.  Q >= 1 always, so this is well-conditioned.
    inv_q = pl.reciprocal(q, approx=True)
    if jnp.dtype(o_ref.dtype).itemsize >= 4:
        # One Newton step restores full f32 accuracy for f32 outputs.
        inv_q = inv_q * (2.0 - q * inv_q)
    # bf16/f16 outputs: approx-reciprocal error (~2^-12) << output precision,
    # so the Newton step is skipped to save VALU cycles.

    o_ref[...] = (p * inv_q).astype(o_ref.dtype)


def _preferred_dimension_semantics(grid_len):
    """CORE_PARALLEL on 2-TC (v7x-class) parts, plain "parallel" elsewhere."""
    if grid_len < 2:
        return ("parallel",)
    try:
        kind = jax.devices()[0].device_kind.lower()
    except Exception:
        return ("parallel",)
    if "v7" in kind or "7x" in kind:
        return (pltpu.CORE_PARALLEL,)
    return ("parallel",)


def rational_on_cluster_forward(x, block_rows=TARGET_BLOCK_ROWS):
    """Apply Rational('relu') elementwise via a lane-dense 1-D grid of tiles."""
    orig_shape = x.shape
    orig_dtype = x.dtype
    total = x.size

    flat = x.reshape(-1)
    rem = total % LANES
    padded_total = total if rem == 0 else total + (LANES - rem)
    if rem != 0:
        # TODO(synk): rare ragged case pays a pad + tail-slice HBM copy; could
        # be avoided by processing the <128-element tail in a separate call.
        flat = jnp.pad(flat, (0, padded_total - total))
    rows = padded_total // LANES
    x2d = flat.reshape(rows, LANES)  # free reshape of contiguous data

    # Small inputs: one block spanning the full row extent (always a legal
    # block shape).  Large inputs: fixed big tiles, ragged tail masked by Pallas.
    br = rows if rows <= block_rows else block_rows
    grid_len = pl.cdiv(rows, br)

    elems = rows * LANES
    itemsize = jnp.dtype(orig_dtype).itemsize
    cost = pl.CostEstimate(
        flops=26 * elems,            # ~26 VPU ops / element (Horner + |.| + Newton + mul)
        transcendentals=elems,       # one EUP reciprocal / element
        bytes_accessed=2 * elems * itemsize,
    )

    def build(dim_sem):
        return pl.pallas_call(
            _rational_kernel,
            out_shape=jax.ShapeDtypeStruct((rows, LANES), orig_dtype),
            grid=(grid_len,),
            in_specs=[pl.BlockSpec((br, LANES), lambda i: (i, 0))],
            out_specs=pl.BlockSpec((br, LANES), lambda i: (i, 0)),
            compiler_params=pltpu.CompilerParams(
                dimension_semantics=dim_sem,
                vmem_limit_bytes=VMEM_LIMIT_BYTES),
            cost_estimate=cost,
        )

    dim_sem = _preferred_dimension_semantics(grid_len)
    try:
        out2d = build(dim_sem)(x2d)
    except Exception:
        if dim_sem == ("parallel",):
            raise
        # CORE_PARALLEL unsupported on this part / jax version: fall back.
        out2d = build(("parallel",))(x2d)

    out = out2d.reshape(-1)
    if rem != 0:
        out = out[:total]
    return out.reshape(orig_shape)


def _reference(x):
    """Pure-JAX reference of Rational version A, degrees (5, 4)."""
    a = jnp.array(NUM_COEFFS, dtype=jnp.float32)
    b = jnp.array(DEN_COEFFS, dtype=jnp.float32)
    xf = x.astype(jnp.float32)
    p = jnp.polyval(a[::-1], xf)
    q = 1.0 + jnp.abs(xf * jnp.polyval(b[::-1], xf))
    return (p / q).astype(x.dtype)


if __name__ == "__main__":
    key = jax.random.PRNGKey(0)
    # NCHW input, as the PyTorch module would receive from a conv stack.
    x = jax.random.normal(key, (2, 4, 16, 16), dtype=jnp.float32)

    out = jax.block_until_ready(rational_on_cluster_forward(x))
    ref = jax.block_until_ready(_reference(x))

    assert out.shape == x.shape and out.dtype == x.dtype
    assert jnp.allclose(out, ref, rtol=1e-5, atol=1e-5), "mismatch vs reference"
    print("KERNEL_OK")
</pallas_src>

<mosaic_0001>
module attributes {stable_mosaic.version = 11 : i64} {
  func.func @_rational_kernel(%arg0: i32, %arg1: memref<16x128xf32, #tpu.memory_space<vmem>>, %arg2: memref<16x128xf32, #tpu.memory_space<vmem>>) attributes {dimension_semantics = [#tpu.dimension_semantics<parallel>], iteration_bounds = array<i64: 1>, scalar_prefetch = 0 : i64, scratch_operands = 0 : i64, tpu.core_type = #tpu.core_type<tc>, window_params = [{transform_indices = @transform_0, window_bounds = array<i64: 16, 128>}, {transform_indices = @transform_1, window_bounds = array<i64: 16, 128>}]} {
    %c0 = arith.constant 0 : index
    %c0_0 = arith.constant 0 : index
    %0 = vector.load %arg1[%c0, %c0_0] : memref<16x128xf32, #tpu.memory_space<vmem>>, vector<16x128xf32>
    %cst = arith.constant 0.252819866 : f32
    %1 = vector.broadcast %cst : f32 to vector<16x128xf32>
    %2 = arith.mulf %0, %1 : vector<16x128xf32>
    %cst_1 = arith.constant 1.52474451 : f32
    %3 = vector.broadcast %cst_1 : f32 to vector<16x128xf32>
    %4 = arith.addf %2, %3 : vector<16x128xf32>
    %5 = arith.mulf %4, %0 : vector<16x128xf32>
    %cst_2 = arith.constant 3.06608081 : f32
    %6 = vector.broadcast %cst_2 : f32 to vector<16x128xf32>
    %7 = arith.addf %5, %6 : vector<16x128xf32>
    %8 = arith.mulf %7, %0 : vector<16x128xf32>
    %cst_3 = arith.constant 2.37539148 : f32
    %9 = vector.broadcast %cst_3 : f32 to vector<16x128xf32>
    %10 = arith.addf %8, %9 : vector<16x128xf32>
    %11 = arith.mulf %10, %0 : vector<16x128xf32>
    %cst_4 = arith.constant 0.616901636 : f32
    %12 = vector.broadcast %cst_4 : f32 to vector<16x128xf32>
    %13 = arith.addf %11, %12 : vector<16x128xf32>
    %14 = arith.mulf %13, %0 : vector<16x128xf32>
    %cst_5 = arith.constant 0.0299634803 : f32
    %15 = vector.broadcast %cst_5 : f32 to vector<16x128xf32>
    %16 = arith.addf %14, %15 : vector<16x128xf32>
    %cst_6 = arith.constant 0.348859817 : f32
    %17 = vector.broadcast %cst_6 : f32 to vector<16x128xf32>
    %18 = arith.mulf %0, %17 : vector<16x128xf32>
    %cst_7 = arith.constant 0.911110341 : f32
    %19 = vector.broadcast %cst_7 : f32 to vector<16x128xf32>
    %20 = arith.addf %18, %19 : vector<16x128xf32>
    %21 = arith.mulf %20, %0 : vector<16x128xf32>
    %cst_8 = arith.constant 4.40811777 : f32
    %22 = vector.broadcast %cst_8 : f32 to vector<16x128xf32>
    %23 = arith.addf %21, %22 : vector<16x128xf32>
    %24 = arith.mulf %23, %0 : vector<16x128xf32>
    %cst_9 = arith.constant 1.19160819 : f32
    %25 = vector.broadcast %cst_9 : f32 to vector<16x128xf32>
    %26 = arith.addf %24, %25 : vector<16x128xf32>
    %27 = arith.mulf %26, %0 : vector<16x128xf32>
    %28 = math.absf %27 : vector<16x128xf32>
    %cst_10 = arith.constant 1.000000e+00 : f32
    %29 = vector.broadcast %cst_10 : f32 to vector<16x128xf32>
    %30 = arith.addf %29, %28 : vector<16x128xf32>
    %31 = tpu.reciprocal %30 {approx = true} : vector<16x128xf32> -> vector<16x128xf32>
    %32 = arith.mulf %30, %31 : vector<16x128xf32>
    %cst_11 = arith.constant 2.000000e+00 : f32
    %33 = vector.broadcast %cst_11 : f32 to vector<16x128xf32>
    %34 = arith.subf %33, %32 : vector<16x128xf32>
    %35 = arith.mulf %31, %34 : vector<16x128xf32>
    %36 = arith.mulf %16, %35 : vector<16x128xf32>
    %c0_12 = arith.constant 0 : index
    %c0_13 = arith.constant 0 : index
    %37 = vector.load %arg2[%c0_12, %c0_13] : memref<16x128xf32, #tpu.memory_space<vmem>>, vector<16x128xf32>
    tpu.vector_store %arg2[%c0_12, %c0_13], %36 {strides = array<i32>} : memref<16x128xf32, #tpu.memory_space<vmem>>, vector<16x128xf32>,
    return
  }
  func.func @transform_0(%arg0: i32) -> (i32, i32) {
    %c0_i32 = arith.constant 0 : i32
    %c0_i32_0 = arith.constant 0 : i32
    return %arg0, %c0_i32 : i32, i32
  }
  func.func @transform_1(%arg0: i32) -> (i32, i32) {
    %c0_i32 = arith.constant 0 : i32
    %c0_i32_0 = arith.constant 0 : i32
    return %arg0, %c0_i32 : i32, i32
  }
}

</mosaic_0001>

<bundles_post_ra>
// kernel: tpu_custom_call.1
= control target key start
LH: loop header
LB: loop body
LE: loop exit
PB: predicated region body
PF: predicated region fallthrough
CT: control target
= control target key end

     0   :  { %6 = vsyncpa [#allocation3], 0  ;;  %s182_s0 = inlined_call_operand.hbm [shape: f32[16,128], index: 0, kind: input, shape index: {}]   ;;  %s183_s1 = inlined_call_operand.hbm [shape: f32[16,128], index: 1, kind: output, shape index: {}]  }
   0x1   :  { %7 = vsyncpa [#allocation4], 0  ;;  %s12_s8 = sshll.u32 %s182_s0, 4  ;;  %s156_s9 = smov [#allocation2]   ;;  %s13_s8 = int_to_ptr.hbm [resolvable:$true] %s12_s8 }
   0x2   :  { %s14_s10 = sshll.u32 %s156_s9, 4  ;;  %s157_s11 = smov 128   ;;  %s15_s10 = int_to_ptr.vmem [resolvable:$true] %s14_s10 }
   0x3   :  { %s158_s12 = smov 8  }
   0x4   :  { %20 = dma.hbm_to_vmem [thread:$0]  %s13_s8, 256, %s15_s10, [#allocation3], %s157_s11, %s157_s11, %s158_s12  }
   0x5   :  { %152 = dma.done.wait [#allocation3], 256  }
   0x6   :  { %153 = vsyncadd [#allocation3], 4294967040  ;;  %v25_v0 = vld [vmem:[#allocation2] sm:$0xff]  ;;  %v26_v1 = vld [vmem:[#allocation2 + $0x8] sm:$0xff]  ;;  %s159_s0 = smov [#allocation5]   ;;  %s83_s16 = sshll.u32 %s183_s1, 4  ;;  %s84_s16 = int_to_ptr.hbm [resolvable:$true] %s83_s16 }
   0x7   :  { %v27_v2 = vmul.f32 0.25281987, %v25_v0  ;;  %v47_v3 = vmul.f32 0.34885982, %v25_v0  ;;  %v28_v4 = vmul.f32 0.25281987, %v26_v1 }
   0x8   :  { %v48_v5 = vmul.f32 0.34885982, %v26_v1  ;;  %s81_s13 = sshll.u32 %s159_s0, 4  ;;  %s82_s13 = int_to_ptr.vmem [resolvable:$true] %s81_s13 }
   0x9   :  { %v29_v6 = vadd.f32 1.5247445, %v27_v2  ;;  %v49_v7 = vadd.f32 0.91111034, %v47_v3  ;;  %v30_v8 = vadd.f32 1.5247445, %v28_v4 }
   0xa   :  { %v50_v9 = vadd.f32 0.91111034, %v48_v5 }
   0xb   :  { %v31_v10 = vmul.f32 %v29_v6, %v25_v0  ;;  %v51_v11 = vmul.f32 %v49_v7, %v25_v0  ;;  %v32_v12 = vmul.f32 %v30_v8, %v26_v1 }
   0xc   :  { %v52_v13 = vmul.f32 %v50_v9, %v26_v1 }
   0xd   :  { %v33_v14 = vadd.f32 3.0660808, %v31_v10  ;;  %v53_v15 = vadd.f32 4.408118, %v51_v11  ;;  %v34_v16 = vadd.f32 3.0660808, %v32_v12 }
   0xe   :  { %v54_v17 = vadd.f32 4.408118, %v52_v13 }
   0xf   :  { %v35_v18 = vmul.f32 %v33_v14, %v25_v0  ;;  %v55_v19 = vmul.f32 %v53_v15, %v25_v0  ;;  %v36_v20 = vmul.f32 %v34_v16, %v26_v1 }
  0x10   :  { %v56_v21 = vmul.f32 %v54_v17, %v26_v1 }
  0x11   :  { %v57_v22 = vadd.f32 1.1916082, %v55_v19  ;;  %v37_v23 = vadd.f32 2.3753915, %v35_v18  ;;  %v38_v26 = vadd.f32 2.3753915, %v36_v20 }
  0x12   :  { %v58_v24 = vadd.f32 1.1916082, %v56_v21 }
  0x13   :  { %v59_v25 = vmul.f32 %v57_v22, %v25_v0  ;;  %v39_v29 = vmul.f32 %v37_v23, %v25_v0  ;;  %v40_v32 = vmul.f32 %v38_v26, %v26_v1 }
  0x14   :  { %v60_v27 = vmul.f32 %v58_v24, %v26_v1 }
  0x15   :  { %v61_v28 = vand.u32 2147483647, %v59_v25  ;;  %v41_v34 = vadd.f32 0.61690164, %v39_v29  ;;  %v42_v35 = vadd.f32 0.61690164, %v40_v32 }
  0x16   :  { %v62_v30 = vand.u32 2147483647, %v60_v27 }
  0x17   :  { %v63_v31 = vadd.f32 1.0, %v61_v28  ;;  %v43_v36 = vmul.f32 %v41_v34, %v25_v0  ;;  %v44_v38 = vmul.f32 %v42_v35, %v26_v1 }
  0x18   :  { %v64_v33 = vadd.f32 1.0, %v62_v30 }
  0x19   :  { %100 = vrcp.f32 %v63_v31  ;;  %v45_v42 = vadd.f32 0.02996348, %v43_v36  ;;  %v46_v44 = vadd.f32 0.02996348, %v44_v38 }
  0x1a   :  { %102 = vrcp.f32 %v64_v33 }
  0x1f   :  { %v101_v37 = vpop.eup %100 }
  0x20   :  { %v103_v39 = vpop.eup %102  ;;  %v67_v40 = vmul.f32 %v101_v37, %v63_v31 }
  0x21   :  { %v68_v41 = vmul.f32 %v103_v39, %v64_v33 }
  0x22   :  { %v69_v43 = vsub.f32 2.0, %v67_v40 }
  0x23   :  { %v70_v45 = vsub.f32 2.0, %v68_v41 }
  0x24   :  { %v71_v46 = vmul.f32 %v101_v37, %v69_v43 }
  0x25   :  { %v72_v47 = vmul.f32 %v103_v39, %v70_v45 }
  0x26   :  { %v73_v48 = vmul.f32 %v71_v46, %v45_v42 }
  0x27   :  { %v74_v49 = vmul.f32 %v72_v47, %v46_v44 }
  0x28   :  { %75 = vst [vmem:[#allocation5] sm:$0xff] %v73_v48 }
  0x29   :  { %76 = vst [vmem:[#allocation5 + $0x8] sm:$0xff] %v74_v49 }
  0x2a   :  { %89 = dma.vmem_to_hbm [thread:$0]  %s82_s13, 256, %s84_s16, [#allocation4], %s157_s11, %s157_s11, %s158_s12  }
  0x2b   :  { %154 = dma.done.wait [#allocation4], 256  }
  0x2c   :  { %155 = vsyncadd [#allocation4], 4294967040 }
  0x2d   :  { %94 = vsyncpa [#allocation3], 1 }
  0x2e   :  { %95 = vsyncpa [#allocation4], 1 }

</bundles_post_ra>
